<compile_context>
chip_gen: v6e
topology: v6e:2x2x1
jax: 0.10.0
libtpu: 0.0.40
codegen_flags: <defaults>
</compile_context>

<pallas_src>
import jax
import jax.numpy as jnp
from jax.experimental import pallas as pl
from jax.experimental.pallas import tpu as pltpu

D_MODEL = 128
D_FF = 512


def _round_up(n: int, m: int) -> int:
    return ((n + m - 1) // m) * m


def _ffn_kernel(x_ref, w1_ref, b1_ref, w2_ref, b2_ref, o_ref):
    # x_ref: (TM, D)   w1_ref: (D, F)   b1_ref: (1, F)
    # w2_ref: (F, D)   b2_ref: (1, D)   o_ref: (TM, D)
    x = x_ref[...]
    h = jnp.dot(x, w1_ref[...], preferred_element_type=jnp.float32)
    h = jnp.maximum(h + b1_ref[...], 0.0)                     # bias + ReLU (VPU)
    out = jnp.dot(h.astype(w2_ref.dtype), w2_ref[...],
                  preferred_element_type=jnp.float32)
    o_ref[...] = (out + b2_ref[...]).astype(o_ref.dtype)


def feed_forward(x, w1, b1, w2, b2, *, block_rows: int = 512):
    """x: (B, S, D) f32.  w1: (D, F), b1: (1, F), w2: (F, D), b2: (1, D)."""
    B, S, D = x.shape
    F = w1.shape[1]
    M = B * S
    x2d = x.reshape(M, D)

    # Large sublane-aligned row tile; grid collapses to 1 step for small inputs.
    TM = min(block_rows, _round_up(M, 8))
    M_pad = _round_up(M, TM)
    if M_pad != M:
        x2d = jnp.pad(x2d, ((0, M_pad - M), (0, 0)))
    n_blocks = M_pad // TM

    # Advisory cost estimate for the XLA scheduler (2 matmuls + elementwise).
    flops = 2 * M_pad * D * F + 2 * M_pad * F * D
    bytes_accessed = 4 * (2 * M_pad * D + 2 * D * F + F + D)
    cost = pl.CostEstimate(flops=flops, transcendentals=0,
                           bytes_accessed=bytes_accessed)

    out2d = pl.pallas_call(
        _ffn_kernel,
        out_shape=jax.ShapeDtypeStruct((M_pad, D), x.dtype),
        grid=(n_blocks,),
        in_specs=[
            pl.BlockSpec((TM, D), lambda i: (i, 0)),   # row tile of activations
            pl.BlockSpec((D, F), lambda i: (0, 0)),    # W1 (resident in VMEM)
            pl.BlockSpec((1, F), lambda i: (0, 0)),    # b1
            pl.BlockSpec((F, D), lambda i: (0, 0)),    # W2 (resident in VMEM)
            pl.BlockSpec((1, D), lambda i: (0, 0)),    # b2
        ],
        out_specs=pl.BlockSpec((TM, D), lambda i: (i, 0)),
        compiler_params=pltpu.CompilerParams(
            dimension_semantics=("parallel",),         # row blocks are independent
        ),
        cost_estimate=cost,
    )(x2d, w1, b1, w2, b2)

    if M_pad != M:
        out2d = out2d[:M]
    return out2d.reshape(B, S, D)


if __name__ == "__main__":
    B, S = 2, 8  # small shapes consistent with the module (d_model=128, d_ff=512)

    key = jax.random.PRNGKey(0)
    kx, k1, k2, k3, k4 = jax.random.split(key, 5)

    x = jax.random.normal(kx, (B, S, D_MODEL), dtype=jnp.float32)

    # Deterministic nn.Linear-style params (uniform in +/- 1/sqrt(fan_in)).
    lim1 = 1.0 / (D_MODEL ** 0.5)
    lim2 = 1.0 / (D_FF ** 0.5)
    w1 = jax.random.uniform(k1, (D_MODEL, D_FF), jnp.float32, -lim1, lim1)
    b1 = jax.random.uniform(k2, (1, D_FF), jnp.float32, -lim1, lim1)
    w2 = jax.random.uniform(k3, (D_FF, D_MODEL), jnp.float32, -lim2, lim2)
    b2 = jax.random.uniform(k4, (1, D_MODEL), jnp.float32, -lim2, lim2)

    out = feed_forward(x, w1, b1, w2, b2)
    out = jax.block_until_ready(out)

    # Plain-JAX reference: relu(x @ W1 + b1) @ W2 + b2
    ref = jnp.maximum(x @ w1 + b1[0], 0.0) @ w2 + b2[0]
    assert out.shape == (B, S, D_MODEL)
    assert jnp.allclose(out, ref, atol=2e-2, rtol=2e-2), "mismatch vs reference"

    print("KERNEL_OK")
</pallas_src>

<mosaic_0001>
module attributes {stable_mosaic.version = 11 : i64} {
  func.func @_ffn_kernel(%arg0: i32, %arg1: memref<16x128xf32, #tpu.memory_space<vmem>>, %arg2: memref<128x512xf32, #tpu.memory_space<vmem>>, %arg3: memref<1x512xf32, #tpu.memory_space<vmem>>, %arg4: memref<512x128xf32, #tpu.memory_space<vmem>>, %arg5: memref<1x128xf32, #tpu.memory_space<vmem>>, %arg6: memref<16x128xf32, #tpu.memory_space<vmem>>) attributes {dimension_semantics = [#tpu.dimension_semantics<parallel>], iteration_bounds = array<i64: 1>, scalar_prefetch = 0 : i64, scratch_operands = 0 : i64, tpu.core_type = #tpu.core_type<tc>, window_params = [{transform_indices = @transform_0, window_bounds = array<i64: 16, 128>}, {pipeline_mode = #tpu.pipeline_mode<synchronous>, transform_indices = @transform_1, window_bounds = array<i64: 128, 512>}, {pipeline_mode = #tpu.pipeline_mode<synchronous>, transform_indices = @transform_2, window_bounds = array<i64: 1, 512>}, {pipeline_mode = #tpu.pipeline_mode<synchronous>, transform_indices = @transform_3, window_bounds = array<i64: 512, 128>}, {pipeline_mode = #tpu.pipeline_mode<synchronous>, transform_indices = @transform_4, window_bounds = array<i64: 1, 128>}, {transform_indices = @transform_5, window_bounds = array<i64: 16, 128>}]} {
    %c0 = arith.constant 0 : index
    %c0_0 = arith.constant 0 : index
    %0 = vector.load %arg1[%c0, %c0_0] : memref<16x128xf32, #tpu.memory_space<vmem>>, vector<16x128xf32>
    %c0_1 = arith.constant 0 : index
    %c0_2 = arith.constant 0 : index
    %1 = vector.load %arg2[%c0_1, %c0_2] : memref<128x512xf32, #tpu.memory_space<vmem>>, vector<128x512xf32>
    %cst = arith.constant dense<0.000000e+00> : vector<16x512xf32>
    %2 = tpu.matmul %0, %1, %cst {dimension_numbers = #tpu.dot_dimension_numbers<[1], [0], [0], [1], [0, 0, 1, 1], [], []>} : vector<16x128xf32>, vector<128x512xf32>, vector<16x512xf32> -> vector<16x512xf32>
    %c0_3 = arith.constant 0 : index
    %c0_4 = arith.constant 0 : index
    %3 = vector.load %arg3[%c0_3, %c0_4] : memref<1x512xf32, #tpu.memory_space<vmem>>, vector<1x512xf32>
    %4 = vector.broadcast %3 : vector<1x512xf32> to vector<16x512xf32>
    %5 = arith.addf %2, %4 : vector<16x512xf32>
    %cst_5 = arith.constant 0.000000e+00 : f32
    %6 = vector.broadcast %cst_5 : f32 to vector<16x512xf32>
    %7 = arith.maximumf %5, %6 : vector<16x512xf32>
    %c0_6 = arith.constant 0 : index
    %c0_7 = arith.constant 0 : index
    %8 = vector.load %arg4[%c0_6, %c0_7] : memref<512x128xf32, #tpu.memory_space<vmem>>, vector<512x128xf32>
    %cst_8 = arith.constant dense<0.000000e+00> : vector<16x128xf32>
    %9 = tpu.matmul %7, %8, %cst_8 {dimension_numbers = #tpu.dot_dimension_numbers<[1], [0], [0], [1], [0, 0, 1, 1], [], []>} : vector<16x512xf32>, vector<512x128xf32>, vector<16x128xf32> -> vector<16x128xf32>
    %c0_9 = arith.constant 0 : index
    %c0_10 = arith.constant 0 : index
    %10 = vector.load %arg5[%c0_9, %c0_10] : memref<1x128xf32, #tpu.memory_space<vmem>>, vector<1x128xf32>
    %11 = vector.broadcast %10 : vector<1x128xf32> to vector<16x128xf32>
    %12 = arith.addf %9, %11 : vector<16x128xf32>
    %c0_11 = arith.constant 0 : index
    %c0_12 = arith.constant 0 : index
    %13 = vector.load %arg6[%c0_11, %c0_12] : memref<16x128xf32, #tpu.memory_space<vmem>>, vector<16x128xf32>
    tpu.vector_store %arg6[%c0_11, %c0_12], %12 {strides = array<i32>} : memref<16x128xf32, #tpu.memory_space<vmem>>, vector<16x128xf32>,
    return
  }
  func.func @transform_0(%arg0: i32) -> (i32, i32) {
    %c0_i32 = arith.constant 0 : i32
    %c0_i32_0 = arith.constant 0 : i32
    return %arg0, %c0_i32 : i32, i32
  }
  func.func @transform_1(%arg0: i32) -> (i32, i32) {
    %c0_i32 = arith.constant 0 : i32
    %c0_i32_0 = arith.constant 0 : i32
    %c0_i32_1 = arith.constant 0 : i32
    return %c0_i32, %c0_i32_0 : i32, i32
  }
  func.func @transform_2(%arg0: i32) -> (i32, i32) {
    %c0_i32 = arith.constant 0 : i32
    %c0_i32_0 = arith.constant 0 : i32
    %c0_i32_1 = arith.constant 0 : i32
    return %c0_i32, %c0_i32_0 : i32, i32
  }
  func.func @transform_3(%arg0: i32) -> (i32, i32) {
    %c0_i32 = arith.constant 0 : i32
    %c0_i32_0 = arith.constant 0 : i32
    %c0_i32_1 = arith.constant 0 : i32
    return %c0_i32, %c0_i32_0 : i32, i32
  }
  func.func @transform_4(%arg0: i32) -> (i32, i32) {
    %c0_i32 = arith.constant 0 : i32
    %c0_i32_0 = arith.constant 0 : i32
    %c0_i32_1 = arith.constant 0 : i32
    return %c0_i32, %c0_i32_0 : i32, i32
  }
  func.func @transform_5(%arg0: i32) -> (i32, i32) {
    %c0_i32 = arith.constant 0 : i32
    %c0_i32_0 = arith.constant 0 : i32
    return %arg0, %c0_i32 : i32, i32
  }
}

</mosaic_0001>

<bundles_post_ra>
// kernel: tpu_custom_call.1
= control target key start
LH: loop header
LB: loop body
LE: loop exit
PB: predicated region body
PF: predicated region fallthrough
CT: control target
= control target key end

     0   :  { %10 = vsyncpa [#allocation3], 0  ;;  %s832_s0 = inlined_call_operand.hbm [shape: f32[16,128], index: 0, kind: input, shape index: {}]   ;;  %s833_s1 = inlined_call_operand.hbm [shape: f32[128,512], index: 1, kind: input, shape index: {}]   ;;  %s834_s2 = inlined_call_operand.hbm [shape: f32[1,512], index: 2, kind: input, shape index: {}]   ;;  %s835_s3 = inlined_call_operand.hbm [shape: f32[512,128], index: 3, kind: input, shape index: {}]   ;;  %s836_s4 = inlined_call_operand.vmem [shape: f32[1,128], index: 4, kind: input, shape index: {}]   ;;  %s837_s5 = inlined_call_operand.hbm [shape: f32[16,128], index: 5, kind: output, shape index: {}]  }
   0x1   :  { %11 = vsyncpa [#allocation6], 0 }
   0x2   :  { %12 = vsyncpa [#allocation9], 0 }
   0x3   :  { %13 = vsyncpa [#allocation4], 0  ;;  %s761_s18 = smov [#allocation5]  }
   0x4   :  { %s31_s19 = sshll.u32 %s761_s18, 4  ;;  %s32_s19 = int_to_ptr.vmem [resolvable:$true] %s31_s19 }
   0x5   :  { %s661_s20 = scalar_lea.vmem %s32_s19, 8192  ;;  %p666_p1 = scmp.lt.s32.totalorder %s32_s19, %s32_s19 }
   0x6   :  { %p662_p0 = scmp.ne.s32.totalorder %s32_s19, %s661_s20  ;;  %p667_p2 = scmp.lt.s32.totalorder %s661_s20, %s661_s20 }
   0x8   :  { %p668_p3 = por %p667_p2, %p666_p1 }
   0xa   :  { %p669_p4 = pnand %p668_p3, %p662_p0 }
   0xc   :  { %672 = shalt.err (!%p669_p4)
}
   0xd   :  { %s762_s21 = smov 512   ;;  %s763_s22 = smov 32  }
   0xe   :  { %37 = dma.hbm_to_vmem [thread:$0]  %s833_s1, 8192, %s32_s19, [#allocation6], %s762_s21, %s762_s21, %s763_s22  }
   0xf   :  { %s764_s25 = smov [#allocation2]  }
  0x10   :  { %s19_s26 = sshll.u32 %s764_s25, 4  ;;  %s20_s26 = int_to_ptr.vmem [resolvable:$true] %s19_s26 }
  0x11   :  { %s681_s27 = scalar_lea.vmem %s20_s26, 256  ;;  %p686_p6 = scmp.lt.s32.totalorder %s20_s26, %s20_s26 }
  0x12   :  { %p682_p5 = scmp.ne.s32.totalorder %s20_s26, %s681_s27  ;;  %p687_p7 = scmp.lt.s32.totalorder %s681_s27, %s681_s27 }
  0x14   :  { %p688_p8 = por %p687_p7, %p686_p6 }
  0x16   :  { %p689_p9 = pnand %p688_p8, %p682_p5 }
  0x18   :  { %692 = shalt.err (!%p689_p9)
}
  0x19   :  { %s765_s28 = smov 128   ;;  %s766_s29 = smov 8  }
  0x1a   :  { %25 = dma.hbm_to_vmem [thread:$0]  %s832_s0, 256, %s20_s26, [#allocation3], %s765_s28, %s765_s28, %s766_s29  }
  0x1b   :  { %s767_s1 = smov [#allocation7]   ;;  %s768_s8 = smov [#allocation8]  }
  0x1c   :  { %s44_s7 = sshll.u32 %s767_s1, 4  ;;  %s53_s9 = sshll.u32 %s768_s8, 4  ;;  %s45_s7 = int_to_ptr.vmem [resolvable:$true] %s44_s7  ;;  %s54_s9 = int_to_ptr.vmem [resolvable:$true] %s53_s9 }
  0x1d   :  { %s701_s10 = scalar_lea.vmem %s45_s7, 64  ;;  %p706_p11 = scmp.lt.s32.totalorder %s45_s7, %s45_s7 }
  0x1e   :  { %p702_p10 = scmp.ne.s32.totalorder %s45_s7, %s701_s10  ;;  %p707_p12 = scmp.lt.s32.totalorder %s701_s10, %s701_s10 }
  0x20   :  { %p708_p13 = por %p707_p12, %p706_p11 }
  0x22   :  { %p709_p0 = pnand %p708_p13, %p702_p10 }
  0x24   :  { %712 = shalt.err (!%p709_p0)
}
  0x25   :  { %47 = dma.hbm_to_vmem [thread:$0]  %s834_s2, 64, %s45_s7, [#allocation6]  }
  0x26   :  { %s721_s13 = scalar_lea.vmem %s54_s9, 8192  ;;  %p726_p2 = scmp.lt.s32.totalorder %s54_s9, %s54_s9 }
  0x27   :  { %p722_p1 = scmp.ne.s32.totalorder %s54_s9, %s721_s13  ;;  %p727_p3 = scmp.lt.s32.totalorder %s721_s13, %s721_s13 }
  0x29   :  { %p728_p4 = por %p727_p3, %p726_p2 }
  0x2b   :  { %p729_p5 = pnand %p728_p4, %p722_p1 }
  0x2d   :  { %732 = shalt.err (!%p729_p5)
}
  0x2e   :  { %59 = dma.hbm_to_vmem [thread:$0]  %s835_s3, 8192, %s54_s9, [#allocation9], %s765_s28, %s765_s28, %s766_s29  }
  0x2f   :  { %753 = dma.done.wait [#allocation3], 256  }
  0x30   :  { %754 = vsyncadd [#allocation3], 4294967040 }
  0x31   :  { %755 = dma.done.wait [#allocation6], 8256  }
  0x32   :  { %756 = vsyncadd [#allocation6], 4294959040 }
  0x33   :  { %757 = dma.done.wait [#allocation9], 8192  }
  0x34   :  { %758 = vsyncadd [#allocation9], 4294959104  ;;  %v769_v0 = vmov 0.0   ;;  %v137_v1 = vld [vmem:[#allocation5 + $0x1e8] sm:$0xff]  ;;  %v139_v2 = vld [vmem:[#allocation5 + $0x1f8] sm:$0xff]  ;;  %s770_s15 = smov [#allocation10]  }
  0x35   :  { %226 = vmatprep.mubr.f32.mxu0 %v769_v0  ;;  %303 = vmatprep.mubr.f32.mxu1 %v769_v0  ;;  %v136_v3 = vld [vmem:[#allocation5 + $0x1e0] sm:$0xff]  ;;  %v138_v4 = vld [vmem:[#allocation5 + $0x1f0] sm:$0xff]  ;;  %v133_v5 = vld [vmem:[#allocation5 + $0x1c8] sm:$0xff]  ;;  %s552_s16 = sshll.u32 %s770_s15, 4  ;;  %s553_s16 = int_to_ptr.vmem [resolvable:$true] %s552_s16 }
  0x36   :  { %162 = vmatprep.subr.mxu0 %v137_v1  ;;  %239 = vmatprep.subr.mxu1 %v139_v2  ;;  %v135_v6 = vld [vmem:[#allocation5 + $0x1d8] sm:$0xff]  ;;  %v132_v7 = vld [vmem:[#allocation5 + $0x1c0] sm:$0xff]  ;;  %v134_v8 = vld [vmem:[#allocation5 + $0x1d0] sm:$0xff]  ;;  %p738_p7 = scmp.lt.s32.totalorder %s553_s16, %s553_s16 }
  0x37   :  { %163 = vmatpush1.msra.mxu0 %v136_v3  ;;  %240 = vmatpush1.msra.mxu1 %v138_v4  ;;  %v129_v9 = vld [vmem:[#allocation5 + $0x1a8] sm:$0xff]  ;;  %v131_v10 = vld [vmem:[#allocation5 + $0x1b8] sm:$0xff]  ;;  %v128_v11 = vld [vmem:[#allocation5 + $0x1a0] sm:$0xff] }
  0x38   :  { %164 = vmatprep.subr.mxu0 %v133_v5  ;;  %241 = vmatprep.subr.mxu1 %v135_v6  ;;  %v130_v12 = vld [vmem:[#allocation5 + $0x1b0] sm:$0xff]  ;;  %v125_v13 = vld [vmem:[#allocation5 + $0x188] sm:$0xff]  ;;  %v127_v14 = vld [vmem:[#allocation5 + $0x198] sm:$0xff] }
  0x39   :  { %165 = vmatpush1.msra.mxu0 %v132_v7  ;;  %242 = vmatpush1.msra.mxu1 %v134_v8  ;;  %v124_v15 = vld [vmem:[#allocation5 + $0x180] sm:$0xff]  ;;  %v126_v16 = vld [vmem:[#allocation5 + $0x190] sm:$0xff]  ;;  %v121_v17 = vld [vmem:[#allocation5 + $0x168] sm:$0xff] }
  0x3a   :  { %166 = vmatprep.subr.mxu0 %v129_v9  ;;  %243 = vmatprep.subr.mxu1 %v131_v10  ;;  %v123_v18 = vld [vmem:[#allocation5 + $0x178] sm:$0xff]  ;;  %v120_v19 = vld [vmem:[#allocation5 + $0x160] sm:$0xff]  ;;  %v122_v20 = vld [vmem:[#allocation5 + $0x170] sm:$0xff] }
  0x3b   :  { %167 = vmatpush1.msra.mxu0 %v128_v11  ;;  %244 = vmatpush1.msra.mxu1 %v130_v12  ;;  %v117_v21 = vld [vmem:[#allocation5 + $0x148] sm:$0xff]  ;;  %v119_v22 = vld [vmem:[#allocation5 + $0x158] sm:$0xff]  ;;  %v116_v23 = vld [vmem:[#allocation5 + $0x140] sm:$0xff] }
  0x3c   :  { %168 = vmatprep.subr.mxu0 %v125_v13  ;;  %245 = vmatprep.subr.mxu1 %v127_v14  ;;  %v118_v24 = vld [vmem:[#allocation5 + $0x150] sm:$0xff]  ;;  %v113_v25 = vld [vmem:[#allocation5 + $0x128] sm:$0xff]  ;;  %v115_v26 = vld [vmem:[#allocation5 + $0x138] sm:$0xff] }
  0x3d   :  { %169 = vmatpush1.msra.mxu0 %v124_v15  ;;  %246 = vmatpush1.msra.mxu1 %v126_v16  ;;  %v112_v27 = vld [vmem:[#allocation5 + $0x120] sm:$0xff]  ;;  %v114_v28 = vld [vmem:[#allocation5 + $0x130] sm:$0xff]  ;;  %v109_v29 = vld [vmem:[#allocation5 + $0x108] sm:$0xff] }
  0x3e   :  { %170 = vmatprep.subr.mxu0 %v121_v17  ;;  %247 = vmatprep.subr.mxu1 %v123_v18  ;;  %v111_v30 = vld [vmem:[#allocation5 + $0x118] sm:$0xff]  ;;  %v108_v31 = vld [vmem:[#allocation5 + $0x100] sm:$0xff]  ;;  %v110_v32 = vld [vmem:[#allocation5 + $0x110] sm:$0xff] }
  0x3f   :  { %171 = vmatpush1.msra.mxu0 %v120_v19  ;;  %248 = vmatpush1.msra.mxu1 %v122_v20  ;;  %v105_v33 = vld [vmem:[#allocation5 + $0xe8] sm:$0xff]  ;;  %v107_v34 = vld [vmem:[#allocation5 + $0xf8] sm:$0xff]  ;;  %v104_v35 = vld [vmem:[#allocation5 + $0xe0] sm:$0xff] }
  0x40   :  { %172 = vmatprep.subr.mxu0 %v117_v21  ;;  %249 = vmatprep.subr.mxu1 %v119_v22  ;;  %v106_v36 = vld [vmem:[#allocation5 + $0xf0] sm:$0xff]  ;;  %v101_v37 = vld [vmem:[#allocation5 + $0xc8] sm:$0xff]  ;;  %v103_v38 = vld [vmem:[#allocation5 + $0xd8] sm:$0xff] }
  0x41   :  { %173 = vmatpush1.msra.mxu0 %v116_v23  ;;  %250 = vmatpush1.msra.mxu1 %v118_v24  ;;  %v100_v39 = vld [vmem:[#allocation5 + $0xc0] sm:$0xff]  ;;  %v102_v40 = vld [vmem:[#allocation5 + $0xd0] sm:$0xff]  ;;  %v97_v41 = vld [vmem:[#allocation5 + $0xa8] sm:$0xff] }
  0x42   :  { %174 = vmatprep.subr.mxu0 %v113_v25  ;;  %251 = vmatprep.subr.mxu1 %v115_v26  ;;  %v99_v42 = vld [vmem:[#allocation5 + $0xb8] sm:$0xff]  ;;  %v96_v43 = vld [vmem:[#allocation5 + $0xa0] sm:$0xff]  ;;  %v98_v44 = vld [vmem:[#allocation5 + $0xb0] sm:$0xff] }
  0x43   :  { %175 = vmatpush1.msra.mxu0 %v112_v27  ;;  %252 = vmatpush1.msra.mxu1 %v114_v28  ;;  %v93_v45 = vld [vmem:[#allocation5 + $0x88] sm:$0xff]  ;;  %v95_v46 = vld [vmem:[#allocation5 + $0x98] sm:$0xff]  ;;  %v92_v47 = vld [vmem:[#allocation5 + $0x80] sm:$0xff] }
  0x44   :  { %176 = vmatprep.subr.mxu0 %v109_v29  ;;  %253 = vmatprep.subr.mxu1 %v111_v30  ;;  %v94_v48 = vld [vmem:[#allocation5 + $0x90] sm:$0xff]  ;;  %v89_v49 = vld [vmem:[#allocation5 + $0x68] sm:$0xff]  ;;  %v91_v50 = vld [vmem:[#allocation5 + $0x78] sm:$0xff] }
  0x45   :  { %177 = vmatpush1.msra.mxu0 %v108_v31  ;;  %254 = vmatpush1.msra.mxu1 %v110_v32  ;;  %v88_v51 = vld [vmem:[#allocation5 + $0x60] sm:$0xff]  ;;  %v90_v52 = vld [vmem:[#allocation5 + $0x70] sm:$0xff]  ;;  %v85_v53 = vld [vmem:[#allocation5 + $0x48] sm:$0xff] }
  0x46   :  { %178 = vmatprep.subr.mxu0 %v105_v33  ;;  %255 = vmatprep.subr.mxu1 %v107_v34  ;;  %v87_v54 = vld [vmem:[#allocation5 + $0x58] sm:$0xff]  ;;  %v84_v55 = vld [vmem:[#allocation5 + $0x40] sm:$0xff]  ;;  %v86_v56 = vld [vmem:[#allocation5 + $0x50] sm:$0xff] }
  0x47   :  { %179 = vmatpush1.msra.mxu0 %v104_v35  ;;  %256 = vmatpush1.msra.mxu1 %v106_v36  ;;  %v81_v57 = vld [vmem:[#allocation5 + $0x28] sm:$0xff]  ;;  %v83_v58 = vld [vmem:[#allocation5 + $0x38] sm:$0xff]  ;;  %v80_v59 = vld [vmem:[#allocation5 + $0x20] sm:$0xff] }
  0x48   :  { %180 = vmatprep.subr.mxu0 %v101_v37  ;;  %257 = vmatprep.subr.mxu1 %v103_v38  ;;  %v82_v60 = vld [vmem:[#allocation5 + $0x30] sm:$0xff]  ;;  %v77_v61 = vld [vmem:[#allocation5 + $0x8] sm:$0xff]  ;;  %v79_v62 = vld [vmem:[#allocation5 + $0x18] sm:$0xff] }
  0x49   :  { %181 = vmatpush1.msra.mxu0 %v100_v39  ;;  %258 = vmatpush1.msra.mxu1 %v102_v40  ;;  %v76_v63 = vld [vmem:[#allocation5] sm:$0xff]  ;;  %v78_v1 = vld [vmem:[#allocation5 + $0x10] sm:$0xff]  ;;  %v75_v7 = vld [vmem:[#allocation2 + $0x8] sm:$0xff] }
  0x4a   :  { %182 = vmatprep.subr.mxu0 %v97_v41  ;;  %259 = vmatprep.subr.mxu1 %v99_v42  ;;  %v74_v2 = vld [vmem:[#allocation2] sm:$0xff]  ;;  %v355_v3 = vld [vmem:[#allocation8 + $0xf8] sm:$0xff]  ;;  %v384_v16 = vld [vmem:[#allocation8 + $0x1e0] sm:$0xff] }
  0x4b   :  { %183 = vmatpush1.msra.mxu0 %v96_v43  ;;  %260 = vmatpush1.msra.mxu1 %v98_v44  ;;  %v387_v4 = vld [vmem:[#allocation8 + $0x1f8] sm:$0xff]  ;;  %v354_v8 = vld [vmem:[#allocation8 + $0xf0] sm:$0xff]  ;;  %v353_v12 = vld [vmem:[#allocation8 + $0xe8] sm:$0xff] }
  0x4c   :  { %184 = vmatprep.subr.mxu0 %v93_v45  ;;  %261 = vmatprep.subr.mxu1 %v95_v46  ;;  %v339_v5 = vld [vmem:[#allocation8 + $0x78] sm:$0xff]  ;;  %v386_v9 = vld [vmem:[#allocation8 + $0x1f0] sm:$0xff]  ;;  %v385_v13 = vld [vmem:[#allocation8 + $0x1e8] sm:$0xff] }
  0x4d   :  { %185 = vmatpush1.msra.mxu0 %v92_v47  ;;  %262 = vmatpush1.msra.mxu1 %v94_v48  ;;  %v371_v6 = vld [vmem:[#allocation8 + $0x178] sm:$0xff]  ;;  %v338_v10 = vld [vmem:[#allocation8 + $0x70] sm:$0xff]  ;;  %v337_v14 = vld [vmem:[#allocation8 + $0x68] sm:$0xff] }
  0x4e   :  { %186 = vmatprep.subr.mxu0 %v89_v49  ;;  %263 = vmatprep.subr.mxu1 %v91_v50  ;;  %v370_v11 = vld [vmem:[#allocation8 + $0x170] sm:$0xff]  ;;  %v369_v15 = vld [vmem:[#allocation8 + $0x168] sm:$0xff]  ;;  %v336_v17 = vld [vmem:[#allocation8 + $0x60] sm:$0xff] }
  0x4f   :  { %187 = vmatpush1.msra.mxu0 %v88_v51  ;;  %264 = vmatpush1.msra.mxu1 %v90_v52  ;;  %v368_v18 = vld [vmem:[#allocation8 + $0x160] sm:$0xff]  ;;  %v351_v19 = vld [vmem:[#allocation8 + $0xd8] sm:$0xff]  ;;  %v350_v23 = vld [vmem:[#allocation8 + $0xd0] sm:$0xff] }
  0x50   :  { %188 = vmatprep.subr.mxu0 %v85_v53  ;;  %265 = vmatprep.subr.mxu1 %v87_v54  ;;  %v383_v20 = vld [vmem:[#allocation8 + $0x1d8] sm:$0xff]  ;;  %v382_v24 = vld [vmem:[#allocation8 + $0x1d0] sm:$0xff]  ;;  %v349_v27 = vld [vmem:[#allocation8 + $0xc8] sm:$0xff] }
  0x51   :  { %189 = vmatpush1.msra.mxu0 %v84_v55  ;;  %266 = vmatpush1.msra.mxu1 %v86_v56  ;;  %v335_v21 = vld [vmem:[#allocation8 + $0x58] sm:$0xff]  ;;  %v334_v25 = vld [vmem:[#allocation8 + $0x50] sm:$0xff]  ;;  %v381_v28 = vld [vmem:[#allocation8 + $0x1c8] sm:$0xff] }
  0x52   :  { %190 = vmatprep.subr.mxu0 %v81_v57  ;;  %267 = vmatprep.subr.mxu1 %v83_v58  ;;  %v367_v22 = vld [vmem:[#allocation8 + $0x158] sm:$0xff]  ;;  %v366_v26 = vld [vmem:[#allocation8 + $0x150] sm:$0xff]  ;;  %v333_v29 = vld [vmem:[#allocation8 + $0x48] sm:$0xff] }
  0x53   :  { %191 = vmatpush1.msra.mxu0 %v80_v59  ;;  %268 = vmatpush1.msra.mxu1 %v82_v60  ;;  %v365_v30 = vld [vmem:[#allocation8 + $0x148] sm:$0xff]  ;;  %v348_v31 = vld [vmem:[#allocation8 + $0xc0] sm:$0xff]  ;;  %v347_v35 = vld [vmem:[#allocation8 + $0xb8] sm:$0xff] }
  0x54   :  { %192 = vmatprep.subr.mxu0 %v77_v61  ;;  %269 = vmatprep.subr.mxu1 %v79_v62  ;;  %v380_v32 = vld [vmem:[#allocation8 + $0x1c0] sm:$0xff]  ;;  %v379_v36 = vld [vmem:[#allocation8 + $0x1b8] sm:$0xff]  ;;  %v346_v39 = vld [vmem:[#allocation8 + $0xb0] sm:$0xff] }
  0x55   :  { %193 = vmatpush1.msra.mxu0 %v76_v63  ;;  %270 = vmatpush1.msra.mxu1 %v78_v1  ;;  %v332_v33 = vld [vmem:[#allocation8 + $0x40] sm:$0xff]  ;;  %v331_v37 = vld [vmem:[#allocation8 + $0x38] sm:$0xff]  ;;  %v378_v40 = vld [vmem:[#allocation8 + $0x1b0] sm:$0xff] }
  0x56   :  { %227 = vmatmul.mubr.f32.vlgmr.msra.gmra.mxu0 %v74_v2  ;;  %304 = vmatmul.mubr.f32.vlgmr.msra.gmra.mxu1 %v74_v2  ;;  %v364_v34 = vld [vmem:[#allocation8 + $0x140] sm:$0xff]  ;;  %v363_v38 = vld [vmem:[#allocation8 + $0x138] sm:$0xff]  ;;  %v330_v41 = vld [vmem:[#allocation8 + $0x30] sm:$0xff] }
  0x57   :  { %232 = vmatprep.mubr.f32.mxu0 %v769_v0  ;;  %309 = vmatprep.mubr.f32.mxu1 %v769_v0  ;;  %v352_v0 = vld [vmem:[#allocation8 + $0xe0] sm:$0xff]  ;;  %v362_v42 = vld [vmem:[#allocation8 + $0x130] sm:$0xff]  ;;  %v345_v43 = vld [vmem:[#allocation8 + $0xa8] sm:$0xff] }
  0x58   :  { %567 = vmatprep.subr.mxu0 %v355_v3  ;;  %605 = vmatprep.subr.mxu1 %v387_v4  ;;  %v377_v44 = vld [vmem:[#allocation8 + $0x1a8] sm:$0xff]  ;;  %v344_v47 = vld [vmem:[#allocation8 + $0xa0] sm:$0xff]  ;;  %v343_v51 = vld [vmem:[#allocation8 + $0x98] sm:$0xff]  ;;  %v142_v4 = vlaneseq }
  0x59   :  { %568 = vmatpush3.msra.mxu0 %v339_v5  ;;  %606 = vmatpush3.msra.mxu1 %v371_v6  ;;  %v329_v45 = vld [vmem:[#allocation8 + $0x28] sm:$0xff]  ;;  %v376_v48 = vld [vmem:[#allocation8 + $0x1a0] sm:$0xff]  ;;  %v375_v52 = vld [vmem:[#allocation8 + $0x198] sm:$0xff] }
  0x5a   :  { %233 = vmatmul.mubr.f32.gmra.mxu0 %v75_v7  ;;  %310 = vmatmul.mubr.f32.gmra.mxu1 %v75_v7  ;;  %v361_v46 = vld [vmem:[#allocation8 + $0x128] sm:$0xff]  ;;  %v328_v49 = vld [vmem:[#allocation8 + $0x20] sm:$0xff]  ;;  %v327_v53 = vld [vmem:[#allocation8 + $0x18] sm:$0xff]  ;;  %v143_v5 = vshrl.u32 %v142_v4, 7 }
  0x5b   :  { %569 = vmatprep.subr.mxu0 %v354_v8  ;;  %607 = vmatprep.subr.mxu1 %v386_v9  ;;  %v360_v50 = vld [vmem:[#allocation8 + $0x120] sm:$0xff]  ;;  %v359_v54 = vld [vmem:[#allocation8 + $0x118] sm:$0xff]  ;;  %v342_v55 = vld [vmem:[#allocation8 + $0x90] sm:$0xff] }
  0x5c   :  { %570 = vmatpush3.msra.mxu0 %v338_v10  ;;  %608 = vmatpush3.msra.mxu1 %v370_v11  ;;  %v374_v56 = vld [vmem:[#allocation8 + $0x190] sm:$0xff]  ;;  %v341_v59 = vld [vmem:[#allocation8 + $0x88] sm:$0xff]  ;;  %v340_v63 = vld [vmem:[#allocation8 + $0x80] sm:$0xff]  ;;  %v152_v6 = vsub.s32 2, %v143_v5  ;;  %v144_v7 = vsub.s32 0, %v143_v5  ;;  %v148_v9 = vsub.s32 1, %v143_v5 }
  0x5d   :  { %571 = vmatprep.subr.mxu0 %v353_v12  ;;  %609 = vmatprep.subr.mxu1 %v385_v13  ;;  %v326_v57 = vld [vmem:[#allocation8 + $0x10] sm:$0xff]  ;;  %v373_v60 = vld [vmem:[#allocation8 + $0x188] sm:$0xff]  ;;  %v372_v1 = vld [vmem:[#allocation8 + $0x180] sm:$0xff]  ;;  %v156_v10 = vsub.s32 3, %v143_v5 }
  0x5e   :  { %572 = vmatpush3.msra.mxu0 %v337_v14  ;;  %610 = vmatpush3.msra.mxu1 %v369_v15  ;;  %v358_v58 = vld [vmem:[#allocation8 + $0x110] sm:$0xff]  ;;  %v325_v61 = vld [vmem:[#allocation8 + $0x8] sm:$0xff]  ;;  %v324_v2 = vld [vmem:[#allocation8] sm:$0xff] }
  0x5f   :  { %573 = vmatprep.subr.mxu0 %v352_v0  ;;  %611 = vmatprep.subr.mxu1 %v384_v16  ;;  %v357_v62 = vld [vmem:[#allocation8 + $0x108] sm:$0xff]  ;;  %v356_v3 = vld [vmem:[#allocation8 + $0x100] sm:$0xff]  ;;  %v140_v8 = vld [vmem:[#allocation7] sm:$0xf] }
  0x60   :  { %574 = vmatpush3.msra.mxu0 %v336_v17  ;;  %612 = vmatpush3.msra.mxu1 %v368_v18  ;;  %v153_v11 = vrot.slane %v140_v8, %v152_v6  ;;  %v145_v12 = vrot.slane %v140_v8, %v144_v7  ;;  %v149_v13 = vrot.slane %v140_v8, %v148_v9 }
  0x61   :  { %575 = vmatprep.subr.mxu0 %v351_v19  ;;  %613 = vmatprep.subr.mxu1 %v383_v20  ;;  %v157_v14 = vrot.slane %v140_v8, %v156_v10 }
  0x62   :  { %576 = vmatpush3.msra.mxu0 %v335_v21  ;;  %614 = vmatpush3.msra.mxu1 %v367_v22 }
  0x63   :  { %577 = vmatprep.subr.mxu0 %v350_v23  ;;  %615 = vmatprep.subr.mxu1 %v382_v24 }
  0x64   :  { %578 = vmatpush3.msra.mxu0 %v334_v25  ;;  %616 = vmatpush3.msra.mxu1 %v366_v26 }
  0x65   :  { %579 = vmatprep.subr.mxu0 %v349_v27  ;;  %617 = vmatprep.subr.mxu1 %v381_v28 }
  0x66   :  { %580 = vmatpush3.msra.mxu0 %v333_v29  ;;  %618 = vmatpush3.msra.mxu1 %v365_v30 }
  0x67   :  { %581 = vmatprep.subr.mxu0 %v348_v31  ;;  %619 = vmatprep.subr.mxu1 %v380_v32 }
  0x68   :  { %582 = vmatpush3.msra.mxu0 %v332_v33  ;;  %620 = vmatpush3.msra.mxu1 %v364_v34 }
  0x69   :  { %583 = vmatprep.subr.mxu0 %v347_v35  ;;  %621 = vmatprep.subr.mxu1 %v379_v36 }
  0x6a   :  { %584 = vmatpush3.msra.mxu0 %v331_v37  ;;  %622 = vmatpush3.msra.mxu1 %v363_v38 }
  0x6b   :  { %585 = vmatprep.subr.mxu0 %v346_v39  ;;  %623 = vmatprep.subr.mxu1 %v378_v40  ;;  %v566_v40 = vld [vmem:[%s836_s4] ss:$0 sm:$0xff]  ;;  %s733_s4 = scalar_lea.vmem %s553_s16, 256 }
  0x6c   :  { %586 = vmatpush3.msra.mxu0 %v330_v41  ;;  %624 = vmatpush3.msra.mxu1 %v362_v42  ;;  %p734_p6 = scmp.ne.s32.totalorder %s553_s16, %s733_s4  ;;  %p739_p8 = scmp.lt.s32.totalorder %s733_s4, %s733_s4 }
  0x6d   :  { %587 = vmatprep.subr.mxu0 %v345_v43  ;;  %625 = vmatprep.subr.mxu1 %v377_v44 }
  0x6e   :  { %588 = vmatpush3.msra.mxu0 %v329_v45  ;;  %626 = vmatpush3.msra.mxu1 %v361_v46  ;;  %p740_p9 = por %p739_p8, %p738_p7 }
  0x6f   :  { %589 = vmatprep.subr.mxu0 %v344_v47  ;;  %627 = vmatprep.subr.mxu1 %v376_v48 }
  0x70   :  { %590 = vmatpush3.msra.mxu0 %v328_v49  ;;  %628 = vmatpush3.msra.mxu1 %v360_v50  ;;  %p741_p10 = pnand %p740_p9, %p734_p6 }
  0x71   :  { %591 = vmatprep.subr.mxu0 %v343_v51  ;;  %629 = vmatprep.subr.mxu1 %v375_v52 }
  0x72   :  { %592 = vmatpush3.msra.mxu0 %v327_v53  ;;  %630 = vmatpush3.msra.mxu1 %v359_v54 }
  0x73   :  { %593 = vmatprep.subr.mxu0 %v342_v55  ;;  %631 = vmatprep.subr.mxu1 %v374_v56 }
  0x74   :  { %594 = vmatpush3.msra.mxu0 %v326_v57  ;;  %632 = vmatpush3.msra.mxu1 %v358_v58 }
  0x75   :  { %595 = vmatprep.subr.mxu0 %v341_v59  ;;  %633 = vmatprep.subr.mxu1 %v373_v60 }
  0x76   :  { %596 = vmatpush3.msra.mxu0 %v325_v61  ;;  %634 = vmatpush3.msra.mxu1 %v357_v62 }
  0x77   :  { %597 = vmatprep.subr.mxu0 %v340_v63  ;;  %635 = vmatprep.subr.mxu1 %v372_v1 }
  0x78   :  { %598 = vmatpush3.msra.mxu0 %v324_v2  ;;  %636 = vmatpush3.msra.mxu1 %v356_v3 }
 0x116   :  { %v228_v15 = vpop.f32.mrf.mxu0  ;;  %v305_v0 = vpop.f32.mrf.mxu1 }
 0x117   :  { %v306_v16 = vadd.f32 %v305_v0, %v153_v11  ;;  %v229_v17 = vadd.f32 %v228_v15, %v145_v12 }
 0x118   :  { %v230_v18 = vpop.f32.mrf.mxu0  ;;  %v307_v19 = vpop.f32.mrf.mxu1 }
 0x119   :  { %v231_v20 = vadd.f32 %v230_v18, %v149_v13  ;;  %v308_v21 = vadd.f32 %v307_v19, %v157_v14  ;;  %v318_v22 = vmax.f32 %v306_v16, 0.0  ;;  %v316_v28 = vmax.f32 %v229_v17, 0.0 }
 0x11a   :  { %v234_v23 = vpop.f32.mrf.mxu0  ;;  %v311_v24 = vpop.f32.mrf.mxu1 }
 0x11b   :  { %v317_v25 = vmax.f32 %v231_v20, 0.0  ;;  %v319_v26 = vmax.f32 %v308_v21, 0.0  ;;  %v312_v27 = vadd.f32 %v311_v24, %v153_v11  ;;  %v235_v29 = vadd.f32 %v234_v23, %v145_v12 }
 0x11c   :  { %v236_v30 = vpop.f32.mrf.mxu0  ;;  %v313_v31 = vpop.f32.mrf.mxu1 }
 0x11d   :  { %v237_v32 = vadd.f32 %v236_v30, %v149_v13  ;;  %v314_v33 = vadd.f32 %v313_v31, %v157_v14  ;;  %459 = vmatprep.mubr.f32.mxu0 %v317_v25  ;;  %534 = vmatprep.mubr.f32.mxu1 %v319_v26  ;;  %v322_v34 = vmax.f32 %v312_v27, 0.0  ;;  %v320_v37 = vmax.f32 %v235_v29, 0.0 }
 0x11e   :  { %460 = vmatmul.mubr.f32.vlgmr.msra.gmra.mxu0 %v316_v28  ;;  %535 = vmatmul.mubr.f32.vlgmr.msra.gmra.mxu1 %v318_v22 }
 0x11f   :  { %v321_v35 = vmax.f32 %v237_v32, 0.0  ;;  %v323_v36 = vmax.f32 %v314_v33, 0.0 }
 0x121   :  { %464 = vmatprep.mubr.f32.mxu0 %v321_v35  ;;  %539 = vmatprep.mubr.f32.mxu1 %v323_v36 }
 0x122   :  { %465 = vmatmul.mubr.f32.gmra.mxu0 %v320_v37  ;;  %540 = vmatmul.mubr.f32.gmra.mxu1 %v322_v34 }
 0x1de   :  { %v599_v38 = vpop.f32.mrf.mxu0  ;;  %v637_v39 = vpop.f32.mrf.mxu1 }
 0x1e0   :  { %v600_v41 = vpop.f32.mrf.mxu0  ;;  %v638_v42 = vpop.f32.mrf.mxu1 }
 0x1e1   :  { %v601_v43 = vadd.f32 %v600_v41, %v599_v38  ;;  %v639_v47 = vadd.f32 %v638_v42, %v637_v39 }
 0x1e2   :  { %v602_v44 = vpop.f32.mrf.mxu0  ;;  %v640_v45 = vpop.f32.mrf.mxu1 }
 0x1e3   :  { %v462_v46 = vadd.f32 %v601_v43, %v566_v40 }
 0x1e4   :  { %v603_v48 = vpop.f32.mrf.mxu0  ;;  %v641_v49 = vpop.f32.mrf.mxu1 }
 0x1e5   :  { %v537_v50 = vadd.f32 %v639_v47, %v462_v46  ;;  %v604_v51 = vadd.f32 %v603_v48, %v602_v44  ;;  %v642_v53 = vadd.f32 %v641_v49, %v640_v45 }
 0x1e7   :  { %545 = vst [vmem:[#allocation10] sm:$0xff] %v537_v50  ;;  %v467_v52 = vadd.f32 %v604_v51, %v566_v40 }
 0x1e9   :  { %v542_v54 = vadd.f32 %v642_v53, %v467_v52 }
 0x1eb   :  { %546 = vst [vmem:[#allocation10 + $0x8] sm:$0xff] %v542_v54 }
 0x1ec   :  { %744 = shalt.err (!%p741_p10)
}
 0x1ed   :  { %558 = dma.vmem_to_hbm [thread:$0]  %s553_s16, 256, %s837_s5, [#allocation4], %s765_s28, %s765_s28, %s766_s29  }
 0x1ee   :  { %759 = dma.done.wait [#allocation4], 256  }
 0x1ef   :  { %760 = vsyncadd [#allocation4], 4294967040 }
 0x1f0   :  { %562 = vsyncpa [#allocation3], 1 }
 0x1f1   :  { %563 = vsyncpa [#allocation6], 1 }
 0x1f2   :  { %564 = vsyncpa [#allocation9], 1 }
 0x1f3   :  { %565 = vsyncpa [#allocation4], 1 }

</bundles_post_ra>
